<compile_context>
chip_gen: v7x
topology: tpu7x:2x2x1
jax: 0.10.0
libtpu: 0.0.40
codegen_flags: <defaults>
</compile_context>

<pallas_src>
import jax
import jax.numpy as jnp
from jax import lax
from jax.experimental import pallas as pl
from jax.experimental.pallas import tpu as pltpu


# ----------------------------------------------------------------------------
# Fused Pallas kernel: bidirectional LSTM + head, all in VMEM.
#   x_ref     : (S, B, D)        time-major embedded input
#   w_in_ref  : (D, 8H + L)      [W_ih_fwd | W_ih_bwd | lw_x]   (gates i|f|o|g)
#   b_in_ref  : (1, 8H + L)      [b_fwd    | b_bwd    | lb  ]
#   whf_ref   : (H, 4H)          forward  hidden->gates (i|f|o|g)
#   whb_ref   : (H, 4H)          backward hidden->gates (i|f|o|g)
#   lw_hf_ref : (H, L)           head-linear rows multiplying forward h
#   lw_hb_ref : (H, L)           head-linear rows multiplying backward h
#   ow_ref    : (L, O), ob_ref : (1, O)
#   out_ref   : (B, O)
# Scratch:
#   xproj_ref : (S, B, 8H + L)   hoisted input projection (+biases)
#   hf_ref    : (S, B, H)        forward hidden states
#   hb_ref    : (S, B, H)        backward hidden states
# ----------------------------------------------------------------------------
def rcnn_kernel(x_ref, w_in_ref, b_in_ref, whf_ref, whb_ref,
                lw_hf_ref, lw_hb_ref, ow_ref, ob_ref,
                out_ref, xproj_ref, hf_ref, hb_ref):
    S, B, D = x_ref.shape
    H = whf_ref.shape[0]
    G = 4 * H
    L = lw_hf_ref.shape[1]
    W = 2 * G + L

    # ---- 1) hoisted input projection (both LSTM directions + head x-term),
    #         biases folded in: one well-shaped MXU matmul, outside the loop.
    x_flat = x_ref[...].reshape(S * B, D)
    proj = (jnp.dot(x_flat, w_in_ref[...], preferred_element_type=jnp.float32)
            + b_in_ref[...])
    xproj_ref[...] = proj.reshape(S, B, W)

    whf = whf_ref[...]
    whb = whb_ref[...]

    def step(pre, h, c, whh):
        g = pre + jnp.dot(h, whh, preferred_element_type=jnp.float32)
        s = jax.nn.sigmoid(g[:, :3 * H])          # i | f | o in one sigmoid
        i_g = s[:, :H]
        f_g = s[:, H:2 * H]
        o_g = s[:, 2 * H:3 * H]
        g_g = jnp.tanh(g[:, 3 * H:])              # g gate
        c_new = f_g * c + i_g * g_g
        h_new = o_g * jnp.tanh(c_new)
        return h_new, c_new

    zeros = jnp.zeros((B, H), jnp.float32)

    # ---- 2) fused forward/backward recurrence: the two independent chains
    #         interleave in the VLIW schedule.
    def body(t, carry):
        hf, cf, hb, cb = carry
        tb = S - 1 - t
        row_f = xproj_ref[t]                      # (B, W)
        row_b = xproj_ref[tb]                     # (B, W)
        hf, cf = step(row_f[:, :G], hf, cf, whf)
        hb, cb = step(row_b[:, G:2 * G], hb, cb, whb)
        hf_ref[t] = hf
        hb_ref[tb] = hb
        return (hf, cf, hb, cb)

    lax.fori_loop(0, S, body, (zeros, zeros, zeros, zeros))

    # ---- 3) head: tanh(linear) -> max over time -> output linear,
    #         computed time-major (no transpose, no concatenate).
    hf_flat = hf_ref[...].reshape(S * B, H)
    hb_flat = hb_ref[...].reshape(S * B, H)
    head_x = xproj_ref[...].reshape(S * B, W)[:, 2 * G:]   # x @ lw_x + lb (precomputed)
    lin = jnp.tanh(
        jnp.dot(hf_flat, lw_hf_ref[...], preferred_element_type=jnp.float32)
        + jnp.dot(hb_flat, lw_hb_ref[...], preferred_element_type=jnp.float32)
        + head_x)
    mx = jnp.max(lin.reshape(S, B, L), axis=0)              # (B, L)  max over time
    out_ref[...] = (jnp.dot(mx, ow_ref[...], preferred_element_type=jnp.float32)
                    + ob_ref[...])


# ----------------------------------------------------------------------------
# Wrapper
# ----------------------------------------------------------------------------
def _perm_gates(w, H):
    """Reorder PyTorch gate blocks [i|f|g|o] -> [i|f|o|g] along last axis."""
    return jnp.concatenate([w[..., :2 * H], w[..., 3 * H:4 * H],
                            w[..., 2 * H:3 * H]], axis=-1)


def rcnn_forward(input_batch, params):
    # Embedding lookups (glue: gather in plain JAX).
    emb = params["emb_table"][input_batch]          # (B, S, E)
    emo = params["emo_table"][input_batch]          # (B, S, EE)
    embedded = jnp.concatenate([emb, emo], axis=2)  # (B, S, D)
    x = jnp.transpose(embedded, (1, 0, 2))          # (S, B, D) time-major

    S, B, D = x.shape
    H = params["whf"].shape[0]
    L = params["lw"].shape[1]
    O = params["ow"].shape[1]
    G = 4 * H

    # One-time parameter repacking (gate reorder + fused projection weights).
    wif_p = _perm_gates(params["wif"], H)
    whf_p = _perm_gates(params["whf"], H)
    bf_p = _perm_gates(params["bf"], H)
    wib_p = _perm_gates(params["wib"], H)
    whb_p = _perm_gates(params["whb"], H)
    bb_p = _perm_gates(params["bb"], H)

    lw = params["lw"]                     # (2H + D, L)
    lw_hf = lw[:H]
    lw_hb = lw[H:2 * H]
    lw_x = lw[2 * H:]

    w_in = jnp.concatenate([wif_p, wib_p, lw_x], axis=1)            # (D, 8H+L)
    b_in = jnp.concatenate([bf_p, bb_p, params["lb"]], axis=1)      # (1, 8H+L)

    vmem = pl.BlockSpec(memory_space=pltpu.MemorySpace.VMEM)

    logits = pl.pallas_call(
        rcnn_kernel,
        out_shape=jax.ShapeDtypeStruct((B, O), jnp.float32),
        in_specs=[vmem] * 9,
        out_specs=vmem,
        scratch_shapes=[
            pltpu.VMEM((S, B, 2 * G + L), jnp.float32),   # xproj
            pltpu.VMEM((S, B, H), jnp.float32),           # forward h
            pltpu.VMEM((S, B, H), jnp.float32),           # backward h
        ],
    )(x, w_in, b_in, whf_p, whb_p, lw_hf, lw_hb, params["ow"], params["ob"])
    return logits


# ----------------------------------------------------------------------------
# Pure-JAX reference for verification (PyTorch gate order i|f|g|o).
# ----------------------------------------------------------------------------
def rcnn_reference(input_batch, params):
    emb = params["emb_table"][input_batch]
    emo = params["emo_table"][input_batch]
    embedded = jnp.concatenate([emb, emo], axis=2)
    x = jnp.transpose(embedded, (1, 0, 2))          # (S, B, D)
    H = params["whf"].shape[0]

    def cell(x_t, h, c, wih, whh, b):
        g = x_t @ wih + h @ whh + b
        i = jax.nn.sigmoid(g[:, :H])
        f = jax.nn.sigmoid(g[:, H:2 * H])
        gg = jnp.tanh(g[:, 2 * H:3 * H])
        o = jax.nn.sigmoid(g[:, 3 * H:])
        c = f * c + i * gg
        h = o * jnp.tanh(c)
        return h, c

    B = x.shape[1]
    h0 = jnp.zeros((B, H), jnp.float32)
    c0 = jnp.zeros((B, H), jnp.float32)

    def fwd_step(carry, x_t):
        h, c = carry
        h, c = cell(x_t, h, c, params["wif"], params["whf"], params["bf"])
        return (h, c), h

    def bwd_step(carry, x_t):
        h, c = carry
        h, c = cell(x_t, h, c, params["wib"], params["whb"], params["bb"])
        return (h, c), h

    _, hs_f = lax.scan(fwd_step, (h0, c0), x)
    _, hs_b = lax.scan(bwd_step, (h0, c0), x, reverse=True)
    lstm_out = jnp.concatenate([hs_f, hs_b], axis=2)            # (S, B, 2H)

    feat = jnp.transpose(jnp.concatenate([lstm_out, x], axis=2), (1, 0, 2))
    lin = jnp.tanh(feat @ params["lw"] + params["lb"])
    mx = jnp.max(lin, axis=1)
    return mx @ params["ow"] + params["ob"]


# ----------------------------------------------------------------------------
# Parameter setup and main.
# ----------------------------------------------------------------------------
def init_params(key, *, vocab_size, pad_idx, emb_dim, emo_dim, hid, lin_units,
                out_size):
    D = emb_dim + emo_dim
    F = 2 * hid + D
    ks = jax.random.split(key, 12)
    scale = 0.1

    emb_table = scale * jax.random.normal(ks[0], (vocab_size, emb_dim), jnp.float32)
    emb_table = emb_table.at[pad_idx].set(0.0)
    emo_table = scale * jax.random.normal(ks[1], (vocab_size, emo_dim), jnp.float32)
    emo_table = emo_table.at[pad_idx].set(0.0)

    def lstm_dir(k):
        k1, k2, k3 = jax.random.split(k, 3)
        w_ih = scale * jax.random.normal(k1, (D, 4 * hid), jnp.float32)
        w_hh = scale * jax.random.normal(k2, (hid, 4 * hid), jnp.float32)
        b = scale * jax.random.normal(k3, (1, 4 * hid), jnp.float32)  # b_ih + b_hh combined
        return w_ih, w_hh, b

    wif, whf, bf = lstm_dir(ks[2])
    wib, whb, bb = lstm_dir(ks[3])

    lw = scale * jax.random.normal(ks[4], (F, lin_units), jnp.float32)
    lb = scale * jax.random.normal(ks[5], (1, lin_units), jnp.float32)
    ow = scale * jax.random.normal(ks[6], (lin_units, out_size), jnp.float32)
    ob = scale * jax.random.normal(ks[7], (1, out_size), jnp.float32)

    return dict(emb_table=emb_table, emo_table=emo_table,
                wif=wif, whf=whf, bf=bf, wib=wib, whb=whb, bb=bb,
                lw=lw, lb=lb, ow=ow, ob=ob)


if __name__ == "__main__":
    # Small, consistent shapes.
    BATCH = 2
    SEQ = 8
    VOCAB = 50
    PAD_IDX = 0
    EMB_DIM = 16
    EMO_DIM = 16
    HID = 32          # lstm_hid_dim, lstm_layers = 1
    LIN_UNITS = 32
    OUT_SIZE = 8

    key = jax.random.PRNGKey(0)
    k_param, k_inp = jax.random.split(key)
    params = init_params(k_param, vocab_size=VOCAB, pad_idx=PAD_IDX,
                         emb_dim=EMB_DIM, emo_dim=EMO_DIM, hid=HID,
                         lin_units=LIN_UNITS, out_size=OUT_SIZE)

    input_batch = jax.random.randint(k_inp, (BATCH, SEQ), 0, VOCAB, dtype=jnp.int32)

    logits = jax.jit(rcnn_forward)(input_batch, params)
    logits = jax.block_until_ready(logits)

    ref = rcnn_reference(input_batch, params)
    assert logits.shape == (BATCH, OUT_SIZE)
    assert jnp.allclose(logits, ref, rtol=1e-4, atol=1e-4), "mismatch vs reference"

    print("KERNEL_OK")
</pallas_src>

<mosaic_0001>
module attributes {stable_mosaic.version = 11 : i64} {
  func.func @rcnn_kernel(%arg0: memref<8x2x32xf32, #tpu.memory_space<vmem>>, %arg1: memref<32x288xf32, #tpu.memory_space<vmem>>, %arg2: memref<1x288xf32, #tpu.memory_space<vmem>>, %arg3: memref<32x128xf32, #tpu.memory_space<vmem>>, %arg4: memref<32x128xf32, #tpu.memory_space<vmem>>, %arg5: memref<32x32xf32, #tpu.memory_space<vmem>>, %arg6: memref<32x32xf32, #tpu.memory_space<vmem>>, %arg7: memref<32x8xf32, #tpu.memory_space<vmem>>, %arg8: memref<1x8xf32, #tpu.memory_space<vmem>>, %arg9: memref<2x8xf32, #tpu.memory_space<vmem>>, %arg10: memref<8x2x288xf32, #tpu.memory_space<vmem>>, %arg11: memref<8x2x32xf32, #tpu.memory_space<vmem>>, %arg12: memref<8x2x32xf32, #tpu.memory_space<vmem>>) attributes {dimension_semantics = [], scalar_prefetch = 0 : i64, scratch_operands = 3 : i64, tpu.core_type = #tpu.core_type<tc>} {
    %c0 = arith.constant 0 : index
    %c0_0 = arith.constant 0 : index
    %c0_1 = arith.constant 0 : index
    %0 = vector.load %arg0[%c0, %c0_0, %c0_1] : memref<8x2x32xf32, #tpu.memory_space<vmem>>, vector<8x2x32xf32>
    %1 = vector.shape_cast %0 : vector<8x2x32xf32> to vector<16x32xf32>
    %c0_2 = arith.constant 0 : index
    %c0_3 = arith.constant 0 : index
    %2 = vector.load %arg1[%c0_2, %c0_3] : memref<32x288xf32, #tpu.memory_space<vmem>>, vector<32x288xf32>
    %cst = arith.constant dense<0.000000e+00> : vector<16x288xf32>
    %3 = tpu.matmul %1, %2, %cst {dimension_numbers = #tpu.dot_dimension_numbers<[1], [0], [0], [1], [0, 0, 1, 1], [], []>} : vector<16x32xf32>, vector<32x288xf32>, vector<16x288xf32> -> vector<16x288xf32>
    %c0_4 = arith.constant 0 : index
    %c0_5 = arith.constant 0 : index
    %4 = vector.load %arg2[%c0_4, %c0_5] : memref<1x288xf32, #tpu.memory_space<vmem>>, vector<1x288xf32>
    %5 = vector.broadcast %4 : vector<1x288xf32> to vector<16x288xf32>
    %6 = arith.addf %3, %5 : vector<16x288xf32>
    %7 = vector.shape_cast %6 : vector<16x288xf32> to vector<8x2x288xf32>
    %c0_6 = arith.constant 0 : index
    %c0_7 = arith.constant 0 : index
    %c0_8 = arith.constant 0 : index
    %8 = vector.load %arg10[%c0_6, %c0_7, %c0_8] : memref<8x2x288xf32, #tpu.memory_space<vmem>>, vector<8x2x288xf32>
    tpu.vector_store %arg10[%c0_6, %c0_7, %c0_8], %7 {strides = array<i32>} : memref<8x2x288xf32, #tpu.memory_space<vmem>>, vector<8x2x288xf32>,
    %c0_9 = arith.constant 0 : index
    %c0_10 = arith.constant 0 : index
    %9 = vector.load %arg3[%c0_9, %c0_10] : memref<32x128xf32, #tpu.memory_space<vmem>>, vector<32x128xf32>
    %c0_11 = arith.constant 0 : index
    %c0_12 = arith.constant 0 : index
    %10 = vector.load %arg4[%c0_11, %c0_12] : memref<32x128xf32, #tpu.memory_space<vmem>>, vector<32x128xf32>
    %cst_13 = arith.constant 0.000000e+00 : f32
    %11 = vector.broadcast %cst_13 : f32 to vector<2x32xf32>
    %c0_i32 = arith.constant 0 : i32
    %c8_i32 = arith.constant 8 : i32
    %12 = arith.addi %c0_i32, %c8_i32 : i32
    %c1_i32 = arith.constant 1 : i32
    %13:4 = scf.for %arg13 = %c0_i32 to %12 step %c1_i32 iter_args(%arg14 = %11, %arg15 = %11, %arg16 = %11, %arg17 = %11) -> (vector<2x32xf32>, vector<2x32xf32>, vector<2x32xf32>, vector<2x32xf32>)  : i32 {
      %c7_i32 = arith.constant 7 : i32
      %36 = arith.subi %c7_i32, %arg13 : i32
      %37 = arith.index_cast %arg13 : i32 to index
      %c0_38 = arith.constant 0 : index
      %c0_39 = arith.constant 0 : index
      %38 = vector.load %arg10[%37, %c0_38, %c0_39] : memref<8x2x288xf32, #tpu.memory_space<vmem>>, vector<1x2x288xf32>
      %39 = vector.shape_cast %38 : vector<1x2x288xf32> to vector<2x288xf32>
      %40 = arith.index_cast %36 : i32 to index
      %c0_40 = arith.constant 0 : index
      %c0_41 = arith.constant 0 : index
      %41 = vector.load %arg10[%40, %c0_40, %c0_41] : memref<8x2x288xf32, #tpu.memory_space<vmem>>, vector<1x2x288xf32>
      %42 = vector.shape_cast %41 : vector<1x2x288xf32> to vector<2x288xf32>
      %43 = vector.extract_strided_slice %39 {offsets = [0, 0], sizes = [2, 128], strides = [1, 1]} : vector<2x288xf32> to vector<2x128xf32>
      %cst_42 = arith.constant dense<0.000000e+00> : vector<2x128xf32>
      %44 = tpu.matmul %arg14, %9, %cst_42 {dimension_numbers = #tpu.dot_dimension_numbers<[1], [0], [0], [1], [0, 0, 1, 1], [], []>} : vector<2x32xf32>, vector<32x128xf32>, vector<2x128xf32> -> vector<2x128xf32>
      %45 = arith.addf %43, %44 : vector<2x128xf32>
      %46 = vector.extract_strided_slice %45 {offsets = [0, 0], sizes = [2, 96], strides = [1, 1]} : vector<2x128xf32> to vector<2x96xf32>
      %47 = arith.negf %46 : vector<2x96xf32>
      %48 = math.exp %47 : vector<2x96xf32>
      %cst_43 = arith.constant 1.000000e+00 : f32
      %49 = vector.broadcast %cst_43 : f32 to vector<2x96xf32>
      %50 = arith.addf %49, %48 : vector<2x96xf32>
      %51 = arith.divf %49, %50 : vector<2x96xf32>
      %52 = vector.extract_strided_slice %51 {offsets = [0, 0], sizes = [2, 32], strides = [1, 1]} : vector<2x96xf32> to vector<2x32xf32>
      %53 = vector.extract_strided_slice %51 {offsets = [0, 32], sizes = [2, 32], strides = [1, 1]} : vector<2x96xf32> to vector<2x32xf32>
      %54 = vector.extract_strided_slice %51 {offsets = [0, 64], sizes = [2, 32], strides = [1, 1]} : vector<2x96xf32> to vector<2x32xf32>
      %55 = vector.extract_strided_slice %45 {offsets = [0, 96], sizes = [2, 32], strides = [1, 1]} : vector<2x128xf32> to vector<2x32xf32>
      %56 = math.tanh %55 : vector<2x32xf32>
      %57 = arith.mulf %53, %arg15 : vector<2x32xf32>
      %58 = arith.mulf %52, %56 : vector<2x32xf32>
      %59 = arith.addf %57, %58 : vector<2x32xf32>
      %60 = math.tanh %59 : vector<2x32xf32>
      %61 = arith.mulf %54, %60 : vector<2x32xf32>
      %62 = vector.extract_strided_slice %42 {offsets = [0, 128], sizes = [2, 128], strides = [1, 1]} : vector<2x288xf32> to vector<2x128xf32>
      %cst_44 = arith.constant dense<0.000000e+00> : vector<2x128xf32>
      %63 = tpu.matmul %arg16, %10, %cst_44 {dimension_numbers = #tpu.dot_dimension_numbers<[1], [0], [0], [1], [0, 0, 1, 1], [], []>} : vector<2x32xf32>, vector<32x128xf32>, vector<2x128xf32> -> vector<2x128xf32>
      %64 = arith.addf %62, %63 : vector<2x128xf32>
      %65 = vector.extract_strided_slice %64 {offsets = [0, 0], sizes = [2, 96], strides = [1, 1]} : vector<2x128xf32> to vector<2x96xf32>
      %66 = arith.negf %65 : vector<2x96xf32>
      %67 = math.exp %66 : vector<2x96xf32>
      %cst_45 = arith.constant 1.000000e+00 : f32
      %68 = vector.broadcast %cst_45 : f32 to vector<2x96xf32>
      %69 = arith.addf %68, %67 : vector<2x96xf32>
      %70 = arith.divf %68, %69 : vector<2x96xf32>
      %71 = vector.extract_strided_slice %70 {offsets = [0, 0], sizes = [2, 32], strides = [1, 1]} : vector<2x96xf32> to vector<2x32xf32>
      %72 = vector.extract_strided_slice %70 {offsets = [0, 32], sizes = [2, 32], strides = [1, 1]} : vector<2x96xf32> to vector<2x32xf32>
      %73 = vector.extract_strided_slice %70 {offsets = [0, 64], sizes = [2, 32], strides = [1, 1]} : vector<2x96xf32> to vector<2x32xf32>
      %74 = vector.extract_strided_slice %64 {offsets = [0, 96], sizes = [2, 32], strides = [1, 1]} : vector<2x128xf32> to vector<2x32xf32>
      %75 = math.tanh %74 : vector<2x32xf32>
      %76 = arith.mulf %72, %arg17 : vector<2x32xf32>
      %77 = arith.mulf %71, %75 : vector<2x32xf32>
      %78 = arith.addf %76, %77 : vector<2x32xf32>
      %79 = math.tanh %78 : vector<2x32xf32>
      %80 = arith.mulf %73, %79 : vector<2x32xf32>
      %81 = arith.index_cast %arg13 : i32 to index
      %c0_46 = arith.constant 0 : index
      %c0_47 = arith.constant 0 : index
      %82 = vector.load %arg11[%81, %c0_46, %c0_47] : memref<8x2x32xf32, #tpu.memory_space<vmem>>, vector<1x2x32xf32>
      %83 = vector.shape_cast %82 : vector<1x2x32xf32> to vector<2x32xf32>
      %84 = vector.shape_cast %61 : vector<2x32xf32> to vector<1x2x32xf32>
      tpu.vector_store %arg11[%81, %c0_46, %c0_47], %84 {strides = array<i32>} : memref<8x2x32xf32, #tpu.memory_space<vmem>>, vector<1x2x32xf32>,
      %85 = arith.index_cast %36 : i32 to index
      %c0_48 = arith.constant 0 : index
      %c0_49 = arith.constant 0 : index
      %86 = vector.load %arg12[%85, %c0_48, %c0_49] : memref<8x2x32xf32, #tpu.memory_space<vmem>>, vector<1x2x32xf32>
      %87 = vector.shape_cast %86 : vector<1x2x32xf32> to vector<2x32xf32>
      %88 = vector.shape_cast %80 : vector<2x32xf32> to vector<1x2x32xf32>
      tpu.vector_store %arg12[%85, %c0_48, %c0_49], %88 {strides = array<i32>} : memref<8x2x32xf32, #tpu.memory_space<vmem>>, vector<1x2x32xf32>,
      scf.yield %61, %59, %80, %78 : vector<2x32xf32>, vector<2x32xf32>, vector<2x32xf32>, vector<2x32xf32>
    }
    %c8_i32_14 = arith.constant 8 : i32
    %c0_15 = arith.constant 0 : index
    %c0_16 = arith.constant 0 : index
    %c0_17 = arith.constant 0 : index
    %14 = vector.load %arg11[%c0_15, %c0_16, %c0_17] : memref<8x2x32xf32, #tpu.memory_space<vmem>>, vector<8x2x32xf32>
    %15 = vector.shape_cast %14 : vector<8x2x32xf32> to vector<16x32xf32>
    %c0_18 = arith.constant 0 : index
    %c0_19 = arith.constant 0 : index
    %c0_20 = arith.constant 0 : index
    %16 = vector.load %arg12[%c0_18, %c0_19, %c0_20] : memref<8x2x32xf32, #tpu.memory_space<vmem>>, vector<8x2x32xf32>
    %17 = vector.shape_cast %16 : vector<8x2x32xf32> to vector<16x32xf32>
    %c0_21 = arith.constant 0 : index
    %c0_22 = arith.constant 0 : index
    %c0_23 = arith.constant 0 : index
    %18 = vector.load %arg10[%c0_21, %c0_22, %c0_23] : memref<8x2x288xf32, #tpu.memory_space<vmem>>, vector<8x2x288xf32>
    %19 = vector.shape_cast %18 : vector<8x2x288xf32> to vector<16x288xf32>
    %20 = vector.extract_strided_slice %19 {offsets = [0, 256], sizes = [16, 32], strides = [1, 1]} : vector<16x288xf32> to vector<16x32xf32>
    %c0_24 = arith.constant 0 : index
    %c0_25 = arith.constant 0 : index
    %21 = vector.load %arg5[%c0_24, %c0_25] : memref<32x32xf32, #tpu.memory_space<vmem>>, vector<32x32xf32>
    %cst_26 = arith.constant dense<0.000000e+00> : vector<16x32xf32>
    %22 = tpu.matmul %15, %21, %cst_26 {dimension_numbers = #tpu.dot_dimension_numbers<[1], [0], [0], [1], [0, 0, 1, 1], [], []>} : vector<16x32xf32>, vector<32x32xf32>, vector<16x32xf32> -> vector<16x32xf32>
    %c0_27 = arith.constant 0 : index
    %c0_28 = arith.constant 0 : index
    %23 = vector.load %arg6[%c0_27, %c0_28] : memref<32x32xf32, #tpu.memory_space<vmem>>, vector<32x32xf32>
    %cst_29 = arith.constant dense<0.000000e+00> : vector<16x32xf32>
    %24 = tpu.matmul %17, %23, %cst_29 {dimension_numbers = #tpu.dot_dimension_numbers<[1], [0], [0], [1], [0, 0, 1, 1], [], []>} : vector<16x32xf32>, vector<32x32xf32>, vector<16x32xf32> -> vector<16x32xf32>
    %25 = arith.addf %22, %24 : vector<16x32xf32>
    %26 = arith.addf %25, %20 : vector<16x32xf32>
    %27 = math.tanh %26 : vector<16x32xf32>
    %28 = vector.shape_cast %27 : vector<16x32xf32> to vector<8x2x32xf32>
    %cst_30 = arith.constant dense<0xFF800000> : vector<2x32xf32>
    %29 = vector.multi_reduction <maximumf>, %28, %cst_30 [0] : vector<8x2x32xf32> to vector<2x32xf32>
    %c0_31 = arith.constant 0 : index
    %c0_32 = arith.constant 0 : index
    %30 = vector.load %arg7[%c0_31, %c0_32] : memref<32x8xf32, #tpu.memory_space<vmem>>, vector<32x8xf32>
    %cst_33 = arith.constant dense<0.000000e+00> : vector<2x8xf32>
    %31 = tpu.matmul %29, %30, %cst_33 {dimension_numbers = #tpu.dot_dimension_numbers<[1], [0], [0], [1], [0, 0, 1, 1], [], []>} : vector<2x32xf32>, vector<32x8xf32>, vector<2x8xf32> -> vector<2x8xf32>
    %c0_34 = arith.constant 0 : index
    %c0_35 = arith.constant 0 : index
    %32 = vector.load %arg8[%c0_34, %c0_35] : memref<1x8xf32, #tpu.memory_space<vmem>>, vector<1x8xf32>
    %33 = vector.broadcast %32 : vector<1x8xf32> to vector<2x8xf32>
    %34 = arith.addf %31, %33 : vector<2x8xf32>
    %c0_36 = arith.constant 0 : index
    %c0_37 = arith.constant 0 : index
    %35 = vector.load %arg9[%c0_36, %c0_37] : memref<2x8xf32, #tpu.memory_space<vmem>>, vector<2x8xf32>
    tpu.vector_store %arg9[%c0_36, %c0_37], %34 {strides = array<i32>} : memref<2x8xf32, #tpu.memory_space<vmem>>, vector<2x8xf32>,
    return
  }
}

</mosaic_0001>

<bundles_post_ra>
// kernel: rcnn_forward.1
= control target key start
LH: loop header
LB: loop body
LE: loop exit
PB: predicated region body
PF: predicated region fallthrough
CT: control target
= control target key end

     0   :  { %14 = vsyncpa [#allocation6], 0  ;;  %v55_v2 = vlaneseq  ;;  %v1455_v7 = vmov 0.0   ;;  %v1456_v13 = vmov 1983009808   ;;  %vm112_vm0 = vcmask 261120   ;;  %s1806_s0 = inlined_call_operand.vmem [shape: f32[8,2,32], index: 0, kind: input, shape index: {}]   ;;  %s1807_s1 = inlined_call_operand.vmem [shape: f32[32,288], index: 1, kind: input, shape index: {}]   ;;  %s1808_s2 = inlined_call_operand.vmem [shape: f32[1,288], index: 2, kind: input, shape index: {}]   ;;  %s1809_s3 = inlined_call_operand.vmem [shape: f32[32,128], index: 3, kind: input, shape index: {}]   ;;  %s1810_s4 = inlined_call_operand.vmem [shape: f32[32,128], index: 4, kind: input, shape index: {}]   ;;  %s1811_s5 = inlined_call_operand.vmem [shape: f32[32,32], index: 5, kind: input, shape index: {}]   ;;  %s1812_s6 = inlined_call_operand.vmem [shape: f32[32,32], index: 6, kind: input, shape index: {}]   ;;  %s1813_s7 = inlined_call_operand.vmem [shape: f32[32,8], index: 7, kind: input, shape index: {}]   ;;  %s1814_s8 = inlined_call_operand.vmem [shape: f32[1,8], index: 8, kind: input, shape index: {}]   ;;  %s1815_s9 = inlined_call_operand.hbm [shape: f32[2,8], index: 9, kind: output, shape index: {}]  }
   0x1   :  { %v42_v0 = vld [vmem:[%s1807_s1 + $0x8] sm:$0xff]  ;;  %v45_v1 = vld [vmem:[%s1807_s1 + $0x20] sm:$0xff]  ;;  %v44_v5 = vld [vmem:[%s1807_s1 + $0x18] sm:$0xff]  ;;  %181 = vmatprep.mubr.f32.mxu0 %v1455_v7  ;;  %v81_v14 = vunpack.c.l.s4 %v1456_v13  ;;  %vm353_vm1 = vcmask 1041408   ;;  %vm354_vm2 = vcmask 1043458   ;;  %vm356_vm4 = vcmask 259076  }
   0x2   :  { %v1265_v3 = vpack.c.bf16 %v45_v1, %v42_v0  ;;  %v41_v4 = vld [vmem:[%s1807_s1] sm:$0xff]  ;;  %v43_v6 = vld [vmem:[%s1807_s1 + $0x10] sm:$0xff]  ;;  %v46_v9 = vld [vmem:[%s1807_s1 + $0x28] sm:$0xff]  ;;  %v56_v12 = vshrl.u32 %v55_v2, 7 }
   0x3   :  { %v1267_v8 = vpack.c.bf16 %v44_v5, %v41_v4  ;;  %v48_v10 = vld [vmem:[%s1807_s1 + $0x38] sm:$0xff]  ;;  %v51_v11 = vld [vmem:[%s1807_s1 + $0x50] sm:$0xff]  ;;  %v1273_v15 = vpack.c.bf16 %v46_v9, %v43_v6  ;;  %v50_v18 = vld [vmem:[%s1807_s1 + $0x48] sm:$0xff]  ;;  %v82_v24 = vunpack.c.0.s8 %v81_v14 }
   0x4   :  { %1266 = vmatprep.subr.bf16.mxu0 %v1265_v3  ;;  %v1269_v16 = vpack.c.bf16 %v51_v11, %v48_v10  ;;  %v47_v17 = vld [vmem:[%s1807_s1 + $0x30] sm:$0xff]  ;;  %v49_v19 = vld [vmem:[%s1807_s1 + $0x40] sm:$0xff]  ;;  %v52_v21 = vld [vmem:[%s1807_s1 + $0x58] sm:$0xff]  ;;  %v57_v51 = vsub.s32 0, %v56_v12  ;;  %v61_v53 = vsub.s32 1, %v56_v12  ;;  %v65_v54 = vsub.s32 2, %v56_v12 }
   0x5   :  { %1268 = vmatpush1.bf16.msra.mxu0 %v1267_v8  ;;  %v1271_v20 = vpack.c.bf16 %v50_v18, %v47_v17  ;;  %v33_v22 = vld [vmem:[%s1806_s0] sm:$0x3]  ;;  %v34_v23 = vld [vmem:[%s1806_s0 + $0x2] sm:$0x3]  ;;  %1274 = vmatprep.subr.bf16.mxu1 %v1273_v15  ;;  %v1277_v25 = vpack.c.bf16 %v52_v21, %v49_v19  ;;  %v35_v26 = vld [vmem:[%s1806_s0 + $0x4] sm:$0x3]  ;;  %v1567_v31 = vsub.s32 %v82_v24, %v56_v12 }
   0x6   :  { %1270 = vmatprep.subr.bf16.mxu0 %v1269_v16  ;;  %v36_v27 = vld [vmem:[%s1806_s0 + $0x6] sm:$0x3]  ;;  %v78_v28 = vcombine.low %v33_v22, %v34_v23  ;;  %v37_v29 = vld [vmem:[%s1806_s0 + $0x8] sm:$0x3]  ;;  %1276 = vmatpush3.bf16.msra.mxu1 %v1273_v15  ;;  %v38_v32 = vld [vmem:[%s1806_s0 + $0xa] sm:$0x3] }
   0x7   :  { %v79_v30 = vcombine.low %v35_v26, %v36_v27  ;;  %v39_v33 = vld [vmem:[%s1806_s0 + $0xc] sm:$0x3]  ;;  %v40_v34 = vld [vmem:[%s1806_s0 + $0xe] sm:$0x3]  ;;  %1278 = vmatprep.subr.bf16.mxu1 %v1277_v25  ;;  %v95_v35 = vcombine.low %v37_v29, %v38_v32  ;;  %v1590_v43 = vld [vmem:[%s1809_s3] sm:$0xff]  ;;  %v1660_v32 = vmov 0.0  }
   0x8   :  { %v96_v36 = vcombine.low %v39_v33, %v40_v34  ;;  %v86_v37 = vrot.slane %v78_v28, %v1567_v31  ;;  %v1595_v44 = vld [vmem:[%s1809_s3 + $0x8] sm:$0xff]  ;;  %v1600_v45 = vld [vmem:[%s1809_s3 + $0x10] sm:$0xff]  ;;  %v1605_v46 = vld [vmem:[%s1809_s3 + $0x18] sm:$0xff]  ;;  %v1662_v33 = vmov 0.0   ;;  %v1664_v34 = vmov 0.0  }
   0x9   :  { %1272 = vmatpush1.bf16.msra.mxu0 %v1271_v20  ;;  %v93_v38 = vrot.slane %v79_v30, %v1567_v31  ;;  %v103_v39 = vrot.slane %v95_v35, %v1567_v31  ;;  %v1610_v47 = vld [vmem:[%s1810_s4] sm:$0xff]  ;;  %v1615_v48 = vld [vmem:[%s1810_s4 + $0x8] sm:$0xff]  ;;  %v1620_v49 = vld [vmem:[%s1810_s4 + $0x10] sm:$0xff]  ;;  %v1658_v30 = vmov 0.0  }
   0xa   :  { %v110_v40 = vrot.slane %v96_v36, %v1567_v31  ;;  %1280 = vmatpush3.bf16.msra.mxu1 %v1277_v25  ;;  %v1625_v50 = vld [vmem:[%s1810_s4 + $0x18] sm:$0xff]  ;;  %v53_v52 = vld [vmem:[%s1808_s2] sm:$0x7]  ;;  %vm355_vm3 = vmor %vm354_vm2, %vm353_vm1  ;;  %s1666_s2 = smov 0  }
   0xb   :  { %v94_v41 = vcombine.low %v86_v37, %v93_v38  ;;  %v58_v55 = vrot.slane %v53_v52, %v57_v51  ;;  %v62_v56 = vrot.slane %v53_v52, %v61_v53  ;;  %v66_v57 = vrot.slane %v53_v52, %v65_v54  ;;  %vm1635_vm5 = vmor %vm356_vm4, %vm355_vm3 }
   0xc   :  { %v111_v42 = vcombine.low %v103_v39, %v110_v40 }
   0xd   :  { %1146 = vmatmul.mubr.msk.f32.vlgmr.msra.gmra.mrb[0].mxu0 %vm112_vm0, %v94_v41  ;;  %1207 = vmatprep.mubr.msk.f32.mxu1 %vm112_vm0, %v94_v41 }
   0xe   :  { %1208 = vmatmul.mubr.msk.f32.vlgmr.msra.gmra.mrb[0].mxu1 %vm112_vm0, %v111_v42  ;;  %187 = vmatprep.mubr.f32.mxu0 %v1455_v7 }
  0x11   :  { %1147 = vmatmul.mubr.msk.f32.gmra.mrb[2].mxu0 %vm112_vm0, %v111_v42 }
  0xe0   :  { %v183_v58 = vpop.f32.mrb[0].mxu0 }
  0xe1   :  { %v184_v59 = vadd.f32 %v183_v58, %v58_v55  ;;  %v185_v60 = vpop.f32.mrb[1].mxu0  ;;  %v1209_v61 = vpop.f32.mrb[0].mxu1 }
  0xe2   :  { %v186_v62 = vadd.f32 %v185_v60, %v62_v56  ;;  %v266_v63 = vadd.f32 %v1209_v61, %v66_v57  ;;  %v260_v0 = vpop.f32.mrb[1].mxu1 }
  0xe3   :  { %v261_v1 = vadd.f32 %v260_v0, %v66_v57 }
  0xe4   :  { %v275_v2 = vcombine.low %v184_v59, %v186_v62  ;;  %v276_v3 = vcombine.high %v184_v59, %v186_v62  ;;  %v312_v4 = vcombine.high %v266_v63, %v266_v63  ;;  %v189_v5 = vpop.f32.mrb[2].mxu0  ;;  %v333_v23 = vrot.slane %v266_v63, %v1567_v31 }
  0xe5   :  { %v277_v6 = vcombine.high %v261_v1, %v261_v1  ;;  %v298_v8 = vrot.slane %v261_v1, %v1567_v31  ;;  %v190_v9 = vadd.f32 %v189_v5, %v58_v55  ;;  %v191_v10 = vpop.f32.mrb[3].mxu0 }
  0xe6   :  { %v284_v11 = vrot.slane %v275_v2, %v1567_v31  ;;  %v291_v12 = vrot.slane %v276_v3, %v1567_v31  ;;  %v192_v13 = vadd.f32 %v191_v10, %v62_v56  ;;  %v340_v14 = vrot.slane %v312_v4, %v1567_v31 }
  0xe7   :  { %v305_v15 = vrot.slane %v277_v6, %v1567_v31 }
  0xe8   :  { %v306_v17 = vcombine.low %v284_v11, %v298_v8  ;;  %v307_v18 = vcombine.high %v284_v11, %v298_v8  ;;  %v310_v19 = vcombine.low %v190_v9, %v192_v13  ;;  %v311_v20 = vcombine.high %v190_v9, %v192_v13 }
  0xe9   :  { %v308_v21 = vcombine.low %v291_v12, %v305_v15  ;;  %v309_v22 = vcombine.high %v291_v12, %v305_v15 }
  0xea   :  { %358 = vst.msk [vmem:[#allocation2] sm:$0x3f] %vm1635_vm5, %v306_v17  ;;  %359 = vst.msk [vmem:[#allocation2 + $0x6] sm:$0x3f] %vm1635_vm5, %v307_v18  ;;  %v319_v24 = vrot.slane %v310_v19, %v1567_v31  ;;  %v326_v25 = vrot.slane %v311_v20, %v1567_v31 }
  0xeb   :  { %360 = vst.msk [vmem:[#allocation2 + $0xc] sm:$0x3f] %vm1635_vm5, %v308_v21  ;;  %361 = vst.msk [vmem:[#allocation2 + $0x12] sm:$0x3f] %vm1635_vm5, %v309_v22 }
  0xec   :  { %v341_v26 = vcombine.low %v319_v24, %v333_v23  ;;  %v342_v27 = vcombine.high %v319_v24, %v333_v23  ;;  %v343_v28 = vcombine.low %v326_v25, %v340_v14  ;;  %v344_v29 = vcombine.high %v326_v25, %v340_v14 }
  0xee   :  { %362 = vst.msk [vmem:[#allocation2 + $0x18] sm:$0x3f] %vm1635_vm5, %v341_v26  ;;  %363 = vst.msk [vmem:[#allocation2 + $0x1e] sm:$0x3f] %vm1635_vm5, %v342_v27 }
  0xef   :  { %364 = vst.msk [vmem:[#allocation2 + $0x24] sm:$0x3f] %vm1635_vm5, %v343_v28  ;;  %365 = vst.msk [vmem:[#allocation2 + $0x2a] sm:$0x3f] %vm1635_vm5, %v344_v29 }
  0xf0 LB: > { %v1282_v35 = vpack.c.bf16 %v1595_v44, %v1590_v43  ;;  %v1457_v36 = vmov 0.0|0.0   ;;  %v1288_v37 = vpack.c.bf16 %v1615_v48, %v1610_v47  ;;  %v400_v38 = vrot.slane %v1449_v34, %v1567_v31  ;;  %s1458_s4 = smov 64   ;;  %s384_s21 = ssub.s32 7, %s1453_s2  ;;  %s1453_s2 = sphi %s1666_s2, %s379_s2   ;;  %v1449_v34 = vphi %v1664_v34, %v499_v34   ;;  %v1445_v33 = vphi %v1662_v33, %v493_v33   ;;  %v1441_v32 = vphi %v1660_v32, %v609_v32   ;;  %v1437_v30 = vphi %v1658_v30, %v603_v30  }
  0xf1   : > { %1281 = vmatprep.subr.bf16.mxu0 %v1457_v36  ;;  %1287 = vmatprep.subr.bf16.mxu1 %v1457_v36  ;;  %v1285_v39 = vpack.c.bf16 %v1605_v46, %v1600_v45  ;;  %v1291_v40 = vpack.c.bf16 %v1625_v50, %v1620_v49  ;;  %v507_v41 = vrot.slane %v1441_v32, %v1567_v31  ;;  %vm1459_vm6 = vmmov 0   ;;  %s1164_s22 = smul.u32 6, %s1453_s2  ;;  %s1461_s26 = smov 32  }
  0xf2   : > { %1283 = vmatpush3.bf16.msra.mxu0 %v1282_v35  ;;  %1289 = vmatpush3.bf16.msra.mxu1 %v1288_v37  ;;  %v1460_v42 = vmov 0.0   ;;  %s1165_s23 = smul.u32 6, %s384_s21  ;;  %s1156_s0 = sshll.u32 %s1453_s2, 1  ;;  %vm623_vm7 = vcmask 254976  }
  0xf3   : > { %1284 = vmatprep.subr.bf16.mxu0 %v1457_v36  ;;  %401 = vrot.lane.b32.xlu0 %v400_v38, %s1458_s4  ;;  %s387_s24 = scalar_lea.vmem [#allocation2], %s1164_s22  ;;  %s1157_s27 = sshll.u32 %s384_s21, 1 }
  0xf4   : > { %1218 = vmatprep.mubr.msk.f32.mxu0 %vm1459_vm6, %v1460_v42  ;;  %1290 = vmatprep.subr.bf16.mxu1 %v1457_v36  ;;  %s391_s25 = scalar_lea.vmem [#allocation2], %s1165_s23  ;;  %s622_s28 = scalar_lea.vmem [#allocation3], %s1156_s0 }
  0xf5   : > { %1229 = vmatprep.mubr.msk.f32.mxu1 %vm1459_vm6, %v1460_v42  ;;  %s637_s29 = scalar_lea.vmem [#allocation4], %s1157_s27  ;;  %s379_s2 = sadd.s32 1, %s1453_s2  }
  0xf6   : > { %1286 = vmatpush3.bf16.msra.mxu0 %v1285_v39  ;;  %1292 = vmatpush3.bf16.msra.mxu1 %v1291_v40  ;;  %v388_v53 = vld [vmem:[%s387_s24] sm:$0x3f]  ;;  %p376_p0 = scmp.ge.s32.totalorder %s379_s2, 8  }
  0xf7   : > { %508 = vrot.lane.b32.xlu0 %v507_v41, %s1458_s4  ;;  %v392_v54 = vld [vmem:[%s391_s25] sm:$0x3f]  ;;  %v668_v26 = vld [vmem:[%s1812_s6 + $0x8] sm:$0xff] (%p376_p0)  ;;  %v669_v27 = vld [vmem:[%s1812_s6 + $0x10] sm:$0xff] (%p376_p0)  ;;  %vm1463_vm8 = vmmov (%p376_p0), 0   ;;  %s1464_s27 = smov (%p376_p0), [#allocation5]  }
  0xf8   : > { %v583_v58 = vrot.slane %v392_v54, 2  ;;  %v667_v25 = vld [vmem:[%s1812_s6] sm:$0xff] (%p376_p0)  ;;  %v670_v29 = vld [vmem:[%s1812_s6 + $0x18] sm:$0xff] (%p376_p0)  ;;  %v664_v38 = vld [vmem:[%s1811_s5 + $0x8] sm:$0xff] (%p376_p0)  ;;  %vm1105_vm9 = vcmask (%p376_p0), 58368  }
  0xf9   :  { %v1293_v28 = vpack.c.bf16 (%p376_p0), %v668_v26, %v667_v25  ;;  %v1297_v36 = vpack.c.bf16 (%p376_p0), %v670_v29, %v669_v27  ;;  %v663_v37 = vld [vmem:[%s1811_s5] sm:$0xff] (%p376_p0)  ;;  %v665_v39 = vld [vmem:[%s1811_s5 + $0x10] sm:$0xff] (%p376_p0)  ;;  %v666_v42 = vld [vmem:[%s1811_s5 + $0x18] sm:$0xff] (%p376_p0) }
  0xfa   :  { %v1301_v41 = vpack.c.bf16 (%p376_p0), %v664_v38, %v663_v37 }
  0xfb   :  { %1294 = vmatprep.subr.bf16.mxu0 (%p376_p0), %v1293_v28 }
 0x165   : > { %v402_v51 = vpop.permute.xlu0 %401 }
 0x166   : > { %1219 = vmatmul.mubr.msk.f32.vlgmr.msra.gmra.mrb[0].mxu0 %vm112_vm0, %v402_v51 }
 0x167   :  { %1296 = vmatpush3.bf16.msra.mxu0 (%p376_p0), %v1293_v28 }
 0x168   :  { %1298 = vmatprep.subr.bf16.mxu0 (%p376_p0), %v1297_v36 }
 0x169   : > { %v509_v52 = vpop.permute.xlu0 %508 }
 0x16a   : > { %1230 = vmatmul.mubr.msk.f32.vlgmr.msra.gmra.mrb[0].mxu1 %vm112_vm0, %v509_v52 }
 0x16b   :  { %1300 = vmatpush3.bf16.msra.mxu0 (%p376_p0), %v1297_v36  ;;  %1262 = vmatprep.mubr.msk.f32.mxu1 (%p376_p0), %vm1463_vm8, %v1455_v7 }
 0x16c   :  { %1302 = vmatprep.subr.bf16.mxu0 (%p376_p0), %v1301_v41 }
 0x239   : > { %v471_v55 = vpop.f32.mrb[0].mxu0 }
 0x23a   : > { %v475_v56 = vadd.f32 %v471_v55, %v388_v53  ;;  %v1220_v57 = vpop.f32.mrb[1].mxu0 }
 0x23c   : > { %1367 = vtanh.f32 %v475_v56  ;;  %v1153_v0 = vmul.f32 -1.442695, %v475_v56 }
 0x23d   : > { %v578_v59 = vpop.f32.mrb[0].mxu1 }
 0x23e   : > { %v585_v60 = vadd.f32 %v583_v58, %v578_v59  ;;  %v1231_v61 = vpop.f32.mrb[1].mxu1 }
 0x240   : > { %1369 = vtanh.f32 %v585_v60  ;;  %v1155_v1 = vmul.f32 -1.442695, %v585_v60 }
 0x241   : > { %1371 = vpow2.f32 %v1153_v0 }
 0x242   : > { %1373 = vpow2.f32 %v1155_v1 }
 0x246   : > { %v1368_v62 = vpop.eup %1367 }
 0x247   : > { %485 = vrot.lane.b32.xlu1 %v1368_v62, %s1461_s26 }
 0x24a   : > { %v1370_v63 = vpop.eup %1369 }
 0x24b   : > { %595 = vrot.lane.b32.xlu1 %v1370_v63, %s1461_s26  ;;  %v1372_v2 = vpop.eup %1371 }
 0x24c   : > { %v479_v3 = vadd.f32 1.0, %v1372_v2  ;;  %v1374_v4 = vpop.eup %1373 }
 0x24d   : > { %v589_v5 = vadd.f32 1.0, %v1374_v4  ;;  %v1305_v4 = vpack.c.bf16 (%p376_p0), %v666_v42, %v665_v39 }
 0x24e   : > { %1375 = vrcp.f32 %v479_v3 }
 0x24f   : > { %1377 = vrcp.f32 %v589_v5 }
 0x258   : > { %v1376_v6 = vpop.eup %1375 }
 0x259   : > { %v1378_v10 = vpop.eup %1377  ;;  %v483_v13 = vmul.f32 %v1445_v33, %v1376_v6 }
 0x25a   : > { %v593_v15 = vmul.f32 %v1437_v30, %v1378_v10 }
 0x2b9   : > { %v486_v8 = vpop.permute.xlu1 %485 }
 0x2ba   : > { %v488_v9 = vmul.f32 %v1376_v6, %v486_v8 }
 0x2bc   : > { %490 = vrot.lane.b32.xlu0 %v488_v9, %s1461_s26 }
 0x2bd   : > { %v596_v11 = vpop.permute.xlu1 %595 }
 0x2be   : > { %v598_v12 = vmul.f32 %v1378_v10, %v596_v11  ;;  %v1021_v11 = vld [vmem:[%s1813_s7] sm:$0xff] (%p376_p0) }
 0x2c0   : > { %600 = vrot.lane.b32.xlu1 %v598_v12, %s1461_s26  ;;  %v1022_v12 = vld [vmem:[%s1813_s7 + $0x8] sm:$0xff] (%p376_p0) }
 0x32e   : > { %v491_v14 = vpop.permute.xlu0 %490 }
 0x32f   : > { %v493_v33 = vadd.f32 %v491_v14, %v483_v13   ;;  %v1023_v13 = vld [vmem:[%s1813_s7 + $0x10] sm:$0xff] (%p376_p0)  ;;  %v1462_v14 = vmov (%p376_p0), 0.0|0.0  }
 0x330   :  { %1309 = vmatprep.subr.bf16.mxu1 (%p376_p0), %v1462_v14 }
 0x331   : > { %1379 = vtanh.f32 %v493_v33 }
 0x332   : > { %v601_v16 = vpop.permute.xlu1 %600 }
 0x333   : > { %v603_v30 = vadd.f32 %v601_v16, %v593_v15   ;;  %v1310_v15 = vpack.c.bf16 (%p376_p0), %v1022_v12, %v1021_v11  ;;  %v1024_v16 = vld [vmem:[%s1813_s7 + $0x18] sm:$0xff] (%p376_p0) }
 0x335   : > { %1381 = vtanh.f32 %v603_v30  ;;  %1311 = vmatpush3.bf16.msra.mxu1 (%p376_p0), %v1310_v15 }
 0x336   :  { %1312 = vmatprep.subr.bf16.mxu1 (%p376_p0), %v1462_v14 }
 0x33b   : > { %v1380_v17 = vpop.eup %1379 }
 0x33c   : > { %496 = vrot.lane.b32.xlu0 %v1380_v17, %s1461_s26  ;;  %v1313_v17 = vpack.c.bf16 (%p376_p0), %v1024_v16, %v1023_v13 }
 0x33e   :  { %1314 = vmatpush3.bf16.msra.mxu1 (%p376_p0), %v1313_v17 }
 0x33f   : > { %v1382_v18 = vpop.eup %1381 }
 0x340   : > { %606 = vrot.lane.b32.xlu1 %v1382_v18, %s1461_s26  ;;  %v1383_v18 = vld [vmem:[#allocation2 + $0x1c] ss:$6 sps:$4 sm:$0x33] (%p376_p0)  }
 0x3ae   : > { %v497_v19 = vpop.permute.xlu0 %496 }
 0x3af   : > { %v499_v34 = vmul.f32 %v1376_v6, %v497_v19   ;;  %v1384_v19 = vld [vmem:[#allocation2 + $0x28] ss:$6 sps:$4 sm:$0x33] (%p376_p0)  }
 0x3b1   : > { %v617_v20 = vrot.slane %v499_v34, %v1567_v31 }
 0x3b2   : > { %v607_v21 = vpop.permute.xlu1 %606 }
 0x3b3   : > { %v609_v32 = vmul.f32 %v1378_v10, %v607_v21   ;;  %618 = vrot.lane.b32.xlu0 %v617_v20, %s1458_s4  ;;  %v1385_v20 = vld [vmem:[#allocation2 + $0x4] ss:$6 sps:$4 sm:$0x33] (%p376_p0)   ;;  %v1386_v21 = vld [vmem:[#allocation2 + $0x10] ss:$6 sps:$4 sm:$0x33] (%p376_p0)  }
 0x3b4   :  { %v936_v25 = vrot.slane (%p376_p0), %v1386_v21, %v1567_v31 }
 0x3b5   : > { %v632_v22 = vrot.slane %v609_v32, %v1567_v31 }
 0x3b7   : > { %633 = vrot.lane.b32.xlu1 %v632_v22, %s1458_s4  ;;  %v946_v22 = vrot.slane (%p376_p0), %v1383_v18, %v1567_v31 }
 0x424   :  { %378 = sbr.rel (!%p376_p0) target bundleno = 240 (0xf0), region = 67 }
 0x425   : > { %v619_v23 = vpop.permute.xlu0 %618 }
 0x426   : > { %624 = vst.msk [vmem:[%s622_s28] sm:$0x3] %vm623_vm7, %v619_v23  ;;  %v953_v23 = vrot.slane (%p376_p0), %v1384_v19, %v1567_v31  ;;  %s1113_s28 = sshll.u32 (%p376_p0), %s1464_s27, 4  ;;  %s1114_s28 = int_to_ptr.vmem [resolvable:$true] %s1113_s28 }
 0x427   :  { %p1396_p2 = scmp.lt.s32.totalorder (%p376_p0), %s1114_s28, %s1114_s28 }
 0x428   :  { %v954_v26 = vcombine.low (%p376_p0), %v946_v22, %v953_v23 }
 0x429   : > { %v634_v24 = vpop.permute.xlu1 %633 }
 0x42a   : > { %638 = vst.msk [vmem:[%s637_s29] sm:$0x3] %vm623_vm7, %v634_v24  ;;  %v929_v24 = vrot.slane (%p376_p0), %v1385_v20, %v1567_v31  ;;  %s1391_s29 = scalar_lea.vmem (%p376_p0), %s1114_s28, 32 }
 0x42b   :  { %p1392_p1 = scmp.ne.s32.totalorder %s1114_s28, %s1391_s29  ;;  %p1397_p3 = scmp.lt.s32.totalorder %s1391_s29, %s1391_s29 }
 0x42c   :  { %v937_v27 = vcombine.low %v929_v24, %v936_v25 }
 0x42d   :  { %v639_v51 = vld [vmem:[#allocation3] sm:$0x3]  ;;  %v640_v52 = vld [vmem:[#allocation3 + $0x2] sm:$0x3]  ;;  %v641_v55 = vld [vmem:[#allocation3 + $0x4] sm:$0x3]  ;;  %p1398_p4 = por %p1397_p3, %p1396_p2 }
 0x42e   :  { %v642_v56 = vld [vmem:[#allocation3 + $0x6] sm:$0x3]  ;;  %v800_v57 = vcombine.low %v639_v51, %v640_v52  ;;  %v643_v58 = vld [vmem:[#allocation3 + $0x8] sm:$0x3]  ;;  %v644_v61 = vld [vmem:[#allocation3 + $0xa] sm:$0x3] }
 0x42f   :  { %v801_v60 = vcombine.low %v641_v55, %v642_v56  ;;  %v645_v62 = vld [vmem:[#allocation3 + $0xc] sm:$0x3]  ;;  %v646_v63 = vld [vmem:[#allocation3 + $0xe] sm:$0x3]  ;;  %v817_v2 = vcombine.low %v643_v58, %v644_v61  ;;  %v1162_v58 = vld [vmem:[%s1814_s8] ss:$0 sm:$0xff]  ;;  %p1399_p5 = pnand %p1398_p4, %p1392_p1 }
 0x430   :  { %v808_v1 = vrot.slane %v800_v57, %v1567_v31  ;;  %v818_v3 = vcombine.low %v645_v62, %v646_v63 }
 0x431   :  { %v647_v34 = vld [vmem:[#allocation4] sm:$0x3]  ;;  %v648_v35 = vld [vmem:[#allocation4 + $0x2] sm:$0x3]  ;;  %v649_v43 = vld [vmem:[#allocation4 + $0x4] sm:$0x3]  ;;  %v815_v5 = vrot.slane %v801_v60, %v1567_v31  ;;  %v825_v8 = vrot.slane %v817_v2, %v1567_v31 }
 0x432   :  { %v650_v44 = vld [vmem:[#allocation4 + $0x6] sm:$0x3]  ;;  %v679_v45 = vcombine.low %v647_v34, %v648_v35  ;;  %v651_v46 = vld [vmem:[#allocation4 + $0x8] sm:$0x3]  ;;  %v652_v48 = vld [vmem:[#allocation4 + $0xa] sm:$0x3]  ;;  %v832_v9 = vrot.slane %v818_v3, %v1567_v31 }
 0x433   :  { %v680_v47 = vcombine.low %v649_v43, %v650_v44  ;;  %v653_v49 = vld [vmem:[#allocation4 + $0xc] sm:$0x3]  ;;  %v654_v50 = vld [vmem:[#allocation4 + $0xe] sm:$0x3]  ;;  %v696_v32 = vcombine.low %v651_v46, %v652_v48  ;;  %v816_v6 = vcombine.low %v808_v1, %v815_v5 }
 0x434   :  { %v687_v30 = vrot.slane %v679_v45, %v1567_v31  ;;  %v697_v33 = vcombine.low %v653_v49, %v654_v50  ;;  %v833_v10 = vcombine.low %v825_v8, %v832_v9 }
 0x435   :  { %v694_v40 = vrot.slane %v680_v47, %v1567_v31  ;;  %v704_v53 = vrot.slane %v696_v32, %v1567_v31 }
 0x436   :  { %v711_v54 = vrot.slane %v697_v33, %v1567_v31 }
 0x437   :  { %v695_v59 = vcombine.low %v687_v30, %v694_v40 }
 0x438   :  { %v712_v0 = vcombine.low %v704_v53, %v711_v54 }
 0x439   :  { %1240 = vmatprep.mubr.msk.f32.mxu0 %vm112_vm0, %v695_v59 }
 0x43a   :  { %1241 = vmatmul.mubr.msk.f32.vlgmr.msra.gmra.mrb[0].mxu0 %vm112_vm0, %v712_v0 }
 0x43b   :  { %1304 = vmatpush3.bf16.msra.mxu0 %v1301_v41  ;;  %1251 = vmatprep.mubr.msk.f32.mxu0 %vm112_vm0, %v816_v6 }
 0x43c   :  { %1306 = vmatprep.subr.bf16.mxu0 %v1305_v4 }
 0x43f   :  { %1308 = vmatpush3.bf16.msra.mxu0 %v1305_v4 }
 0x442   :  { %1252 = vmatmul.mubr.msk.f32.vlgmr.msra.gmra.mrb[0].mxu0 %vm112_vm0, %v833_v10 }
 0x515   :  { %v1253_v28 = vpop.f32.mrb[0].mxu0 }
 0x516   :  { %v958_v7 = vadd.f32 %v1253_v28, %v954_v26  ;;  %v904_v29 = vpop.f32.mrb[1].mxu0 }
 0x517   :  { %v957_v34 = vadd.f32 %v937_v27, %v904_v29 }
 0x518   :  { %1387 = vtanh.f32 %v958_v7 }
 0x519   :  { %1389 = vtanh.f32 %v957_v34 }
 0x522   :  { %v1388_v35 = vpop.eup %1387 }
 0x523   :  { %v1390_v36 = vpop.eup %1389  ;;  %v980_v43 = vcombine.high %v1388_v35, %v1388_v35  ;;  %v987_v44 = vrot.slane %v1388_v35, %v1567_v31 }
 0x524   :  { %v963_v45 = vcombine.high %v1390_v36, %v1390_v36  ;;  %v970_v46 = vrot.slane %v1390_v36, %v1567_v31 }
 0x525   :  { %v994_v47 = vrot.slane %v980_v43, %v1567_v31  ;;  %v995_v48 = vcombine.high %v987_v44, %v987_v44  ;;  %v1010_v49 = vsel %vm623_vm7, %v987_v44, -inf }
 0x526   :  { %v977_v50 = vrot.slane %v963_v45, %v1567_v31  ;;  %v978_v30 = vcombine.high %v970_v46, %v970_v46  ;;  %v1006_v32 = vsel %vm623_vm7, %v970_v46, -inf }
 0x527   :  { %v996_v33 = vcombine.high %v994_v47, %v994_v47  ;;  %v1011_v37 = vmax.f32 %v1006_v32, %v1010_v49  ;;  %v1012_v38 = vsel %vm623_vm7, %v995_v48, -inf  ;;  %v1014_v39 = vsel %vm623_vm7, %v994_v47, -inf }
 0x528   :  { %v979_v40 = vcombine.high %v977_v50, %v977_v50  ;;  %v1007_v41 = vsel %vm623_vm7, %v978_v30, -inf  ;;  %v1008_v42 = vsel %vm623_vm7, %v977_v50, -inf }
 0x529   :  { %v1013_v51 = vmax.f32 %v1007_v41, %v1012_v38  ;;  %v1015_v52 = vmax.f32 %v1008_v42, %v1014_v39  ;;  %v1016_v53 = vsel %vm623_vm7, %v996_v33, -inf }
 0x52a   :  { %v1009_v31 = vsel %vm623_vm7, %v979_v40, -inf }
 0x52b   :  { %v1017_v54 = vmax.f32 %v1009_v31, %v1016_v53  ;;  %v1018_v55 = vmax.f32 %v1011_v37, %v1013_v51 }
 0x52d   :  { %v1019_v56 = vmax.f32 %v1015_v52, %v1017_v54 }
 0x52f   :  { %v1020_v57 = vmax.f32 %v1018_v55, %v1019_v56 }
 0x531   :  { %1263 = vmatmul.mubr.msk.f32.vlgmr.msra.gmra.mrb[0].mxu1 %vm112_vm0, %v1020_v57 }
 0x604   :  { %v1101_v59 = vpop.f32.mrb[0].mxu1 }
 0x605   :  { %v1102_v60 = vadd.f32 %v1162_v58, %v1101_v59  ;;  %v1264_v61 = vpop.f32.mrb[1].mxu1 }
 0x607   :  { %1106 = vst.msk [vmem:[#allocation5] sm:$0x3] %vm1105_vm9, %v1102_v60 }
 0x608   :  { %1402 = shalt.err (!%p1399_p5)
}
 0x609   :  { %s1403_s11 = scalar_lea.hbm %s1815_s9, 32 }
 0x60a   :  { %p1404_p6 = scmp.ne.s32.totalorder %s1815_s9, %s1403_s11  ;;  %p1407_p7 = scmp.lt.u32.totalorder %s1403_s11, %s1815_s9 }
 0x60c   :  { %p1409_p8 = pnand %p1407_p7, %p1404_p6 }
 0x60e   :  { %1412 = shalt.err (!%p1409_p8)
}
 0x60f   :  { %1116 = dma.vmem_to_hbm [thread:$0]  %s1114_s28, 32, %s1815_s9, [#allocation6]  }
 0x610   :  { %1433 = dma.done.wait [#allocation6], 32  }
 0x611   :  { %1434 = vsyncadd [#allocation6], 4294967264 }
 0x612   :  { %1120 = vsyncpa [#allocation6], 1 }

</bundles_post_ra>
